<compile_context>
chip_gen: v6e
topology: v6e:2x2x1
jax: 0.10.0
libtpu: 0.0.40
codegen_flags: <defaults>
</compile_context>

<pallas_src>
import math
import functools

import jax
import jax.numpy as jnp
from jax.experimental import pallas as pl
from jax.experimental.pallas import tpu as pltpu


# ----------------------------------------------------------------------------
# Fused NP forward kernel (feature-major: activations are (features, rows))
# ----------------------------------------------------------------------------
def _np_fused_kernel(z_dim, y_dim, num_batch, training,
                     ct_ref, selenc_ref, tx_ref, seldec_ref, eps_ref,
                     ew1_ref, eb1_ref, ew2_ref, eb2_ref, ewh_ref, ebh_ref,
                     dw1x_ref, dw1z_ref, db1_ref, dw2_ref, db2_ref,
                     dwh_ref, dbh_ref,
                     lat_ref, out_ref):
    f32 = jnp.float32
    B = num_batch

    # ---- z-encoder over the stacked [C ; T] point columns -------------------
    # ct_ref: (Din, B*(Nc+Nt));  h: (H, B*(Nc+Nt))
    h = jnp.dot(ew1_ref[...], ct_ref[...], preferred_element_type=f32) + eb1_ref[...]
    h = jnp.maximum(h, 0.0)
    h = jnp.dot(ew2_ref[...], h, preferred_element_type=f32) + eb2_ref[...]
    h = jnp.maximum(h, 0.0)

    # Per-batch mean over points as one MXU matmul with a selector matrix:
    # columns [:B] are the context means, columns [B:] the target means.
    s = jnp.dot(h, selenc_ref[...], preferred_element_type=f32)            # (H, 2B)

    # mu || sigma latent head; sigma rows get 0.1 + 0.9*sigmoid.
    raw = jnp.dot(ewh_ref[...], s, preferred_element_type=f32) + ebh_ref[...]  # (2z, 2B)
    row = jax.lax.broadcasted_iota(jnp.int32, raw.shape, 0)
    lat = jnp.where(row < z_dim, raw, 0.1 + 0.9 * jax.nn.sigmoid(raw))
    lat_ref[...] = lat

    # ---- reparameterization (prior = columns [:B], posterior = [B:]) --------
    c0 = B if training else 0
    mu = lat[:z_dim, c0:c0 + B]                                            # (z, B)
    sg = lat[z_dim:, c0:c0 + B]                                            # (z, B)
    z = mu + sg * eps_ref[...]                                             # (z, B)

    # ---- decoder -------------------------------------------------------------
    # z contribution of layer 1 (includes its bias), broadcast to each target
    # row of its batch via a one-hot selector matmul.
    zb = jnp.dot(dw1z_ref[...], z, preferred_element_type=f32) + db1_ref[...]   # (H, B)
    zb = jnp.dot(zb, seldec_ref[...], preferred_element_type=f32)              # (H, N)

    hd = jnp.dot(dw1x_ref[...], tx_ref[...], preferred_element_type=f32) + zb  # (H, N)
    hd = jnp.maximum(hd, 0.0)
    hd = jnp.dot(dw2_ref[...], hd, preferred_element_type=f32) + db2_ref[...]
    hd = jnp.maximum(hd, 0.0)

    # mu || sigma decoder head (lane-dense output: rows = 2*y_dim, cols = B*Nt);
    # sigma rows get 0.1 + 0.9*softplus.
    rawd = jnp.dot(dwh_ref[...], hd, preferred_element_type=f32) + dbh_ref[...]  # (2y, N)
    rowd = jax.lax.broadcasted_iota(jnp.int32, rawd.shape, 0)
    out_ref[...] = jnp.where(rowd < y_dim, rawd, 0.1 + 0.9 * jax.nn.softplus(rawd))


def np_fused_pallas(ct_T, sel_enc_T, tx_T, sel_dec_T, eps_T, enc, dec,
                    z_dim, y_dim, training):
    """Single fused pallas_call for the whole NP forward.

    Returns (lat_T, out):
      lat_T: (2*z_dim, 2*B)  -- [mu;sigma] x [prior(C) cols | posterior(T) cols]
      out:   (2*y_dim, B*Nt) -- [y_mu rows ; y_sigma rows], lane-dense.
    """
    twoB = sel_enc_T.shape[1]
    N = tx_T.shape[1]
    Z2 = enc["wh"].shape[0]
    Y2 = dec["wh"].shape[0]

    kernel = functools.partial(_np_fused_kernel, z_dim, y_dim, twoB // 2, training)

    def full(shape):
        return pl.BlockSpec(shape, lambda i, _n=len(shape): (0,) * _n)

    lat_T, out = pl.pallas_call(
        kernel,
        out_shape=(jax.ShapeDtypeStruct((Z2, twoB), jnp.float32),
                   jax.ShapeDtypeStruct((Y2, N), jnp.float32)),
        grid=(1,),
        in_specs=[
            full(ct_T.shape), full(sel_enc_T.shape), full(tx_T.shape),
            full(sel_dec_T.shape), full(eps_T.shape),
            full(enc["w1"].shape), full(enc["b1"].shape),
            full(enc["w2"].shape), full(enc["b2"].shape),
            full(enc["wh"].shape), full(enc["bh"].shape),
            full(dec["w1x"].shape), full(dec["w1z"].shape), full(dec["b1"].shape),
            full(dec["w2"].shape), full(dec["b2"].shape),
            full(dec["wh"].shape), full(dec["bh"].shape),
        ],
        out_specs=(full((Z2, twoB)), full((Y2, N))),
        compiler_params=pltpu.CompilerParams(dimension_semantics=("arbitrary",)),
    )(ct_T, sel_enc_T, tx_T, sel_dec_T, eps_T,
      enc["w1"], enc["b1"], enc["w2"], enc["b2"], enc["wh"], enc["bh"],
      dec["w1x"], dec["w1z"], dec["b1"], dec["w2"], dec["b2"],
      dec["wh"], dec["bh"])
    return lat_T, out


# ----------------------------------------------------------------------------
# Parameter initialization (PyTorch nn.Linear-style uniform init, stored in
# the feature-major / transposed layout the kernel consumes).
# ----------------------------------------------------------------------------
def _init_linear_T(key, fan_in, fan_out):
    kw, kb = jax.random.split(key)
    bound = 1.0 / math.sqrt(fan_in)
    w = jax.random.uniform(kw, (fan_out, fan_in), jnp.float32, -bound, bound)
    b = jax.random.uniform(kb, (fan_out, 1), jnp.float32, -bound, bound)
    return w, b


def init_np_params(key, x_dim, y_dim, hid_dim, z_dim):
    keys = jax.random.split(key, 8)
    enc = {}
    enc["w1"], enc["b1"] = _init_linear_T(keys[0], x_dim + y_dim, hid_dim)
    enc["w2"], enc["b2"] = _init_linear_T(keys[1], hid_dim, hid_dim)
    wmu, bmu = _init_linear_T(keys[2], hid_dim, z_dim)
    wsig, bsig = _init_linear_T(keys[3], hid_dim, z_dim)
    enc["wh"] = jnp.concatenate([wmu, wsig], axis=0)      # (2*z_dim, H)
    enc["bh"] = jnp.concatenate([bmu, bsig], axis=0)      # (2*z_dim, 1)

    dec = {}
    w1, dec["b1"] = _init_linear_T(keys[4], x_dim + z_dim, hid_dim)
    dec["w1x"], dec["w1z"] = w1[:, :x_dim], w1[:, x_dim:]  # split of concat-W1
    dec["w2"], dec["b2"] = _init_linear_T(keys[5], hid_dim, hid_dim)
    wmu, bmu = _init_linear_T(keys[6], hid_dim, y_dim)
    wsig, bsig = _init_linear_T(keys[7], hid_dim, y_dim)
    dec["wh"] = jnp.concatenate([wmu, wsig], axis=0)      # (2*y_dim, H)
    dec["bh"] = jnp.concatenate([bmu, bsig], axis=0)      # (2*y_dim, 1)
    return {"enc": enc, "dec": dec}


# ----------------------------------------------------------------------------
# NP forward (equivalent of NP.forward with KL=None, NLL=None, update_=False,
# return_=True; eval mode -> z sampled from the prior).  Fully jitted.
# ----------------------------------------------------------------------------
# TODO(synk): ANP attention path, 'mul' Encoder/Decoder variants (unused for
# model="NP") and the Adam update / grad clipping (update_=True) are
# training-side ops, not forward kernels, and are omitted.
@functools.partial(jax.jit, static_argnames=("x_dim", "y_dim", "training"))
def np_forward(C, T, params, sample_key, *, x_dim, y_dim, training=False):
    enc, dec = params["enc"], params["dec"]
    z_dim = enc["wh"].shape[0] // 2
    B, Nc, Din = C.shape
    Nt = T.shape[1]
    N = B * Nt

    Tx = T[:, :, :x_dim]
    Ty = T[:, :, -y_dim:]

    # Feature-major kernel inputs (cheap XLA reshapes/transposes, fused by jit).
    ct_T = jnp.concatenate([C.reshape(B * Nc, Din), T.reshape(B * Nt, Din)], axis=0).T
    tx_T = Tx.reshape(N, x_dim).T

    # Segmented-mean selector (compile-time constant): (B*(Nc+Nt), 2B).
    # Columns [:B] average each batch's context rows; [B:] its target rows.
    bids = jnp.arange(B)
    sel_c = (jnp.repeat(bids, Nc)[:, None] == bids[None, :]).astype(jnp.float32) / Nc
    sel_t = (jnp.repeat(bids, Nt)[:, None] == bids[None, :]).astype(jnp.float32) / Nt
    sel_enc_T = jnp.concatenate(
        [jnp.concatenate([sel_c, jnp.zeros((B * Nc, B), jnp.float32)], axis=1),
         jnp.concatenate([jnp.zeros((B * Nt, B), jnp.float32), sel_t], axis=1)],
        axis=0)

    # Per-target-row batch one-hot (B, B*Nt): broadcasts the z-bias to its rows.
    sel_dec_T = (bids[:, None] == (jnp.arange(N) // Nt)[None, :]).astype(jnp.float32)

    eps_T = jax.random.normal(sample_key, (z_dim, B), dtype=jnp.float32)

    lat_T, out = np_fused_pallas(ct_T, sel_enc_T, tx_T, sel_dec_T, eps_T,
                                 enc, dec, z_dim, y_dim, training)

    # KL( q(T) || p(C) ) for diagonal Gaussians, summed over z_dim, mean over B.
    mu_p, sig_p = lat_T[:z_dim, :B], lat_T[z_dim:, :B]
    mu_q, sig_q = lat_T[:z_dim, B:], lat_T[z_dim:, B:]
    kl = (jnp.log(sig_p / sig_q)
          + (sig_q ** 2 + (mu_q - mu_p) ** 2) / (2.0 * sig_p ** 2) - 0.5)
    KL = kl.sum(axis=0).mean()

    # Split + transpose the lane-dense decoder slab back to (B, Nt, y_dim).
    y_mu = out[:y_dim].T.reshape(B, Nt, y_dim)
    y_sig = out[y_dim:].T.reshape(B, Nt, y_dim)

    log_prob = (-0.5 * jnp.log(2.0 * jnp.pi)
                - jnp.log(y_sig)
                - 0.5 * ((Ty - y_mu) / y_sig) ** 2)
    NLL = -(log_prob.sum(axis=-1).mean())

    NP_loss = KL + NLL
    T_MSE = jnp.mean((Ty - y_mu) ** 2)
    return NP_loss, KL, NLL, T_MSE, (y_mu, y_sig)


# ----------------------------------------------------------------------------
if __name__ == "__main__":
    x_dim, y_dim = 2, 1
    hid_dim, z_dim = 32, 16
    B, num_ctx, num_tgt = 2, 8, 12

    root = jax.random.PRNGKey(0)
    k_param, k_cx, k_cy, k_tx, k_ty, k_sample = jax.random.split(root, 6)

    params = init_np_params(k_param, x_dim, y_dim, hid_dim, z_dim)

    Cx = jax.random.normal(k_cx, (B, num_ctx, x_dim), jnp.float32)
    Cy = jax.random.normal(k_cy, (B, num_ctx, y_dim), jnp.float32)
    Txi = jax.random.normal(k_tx, (B, num_tgt, x_dim), jnp.float32)
    Tyi = jax.random.normal(k_ty, (B, num_tgt, y_dim), jnp.float32)
    C = jnp.concatenate([Cx, Cy], axis=-1)    # (B, num_ctx, x_dim + y_dim)
    T = jnp.concatenate([Txi, Tyi], axis=-1)  # (B, num_tgt, x_dim + y_dim)

    loss, KL, NLL, mse, (y_mu, y_sig) = np_forward(
        C, T, params, k_sample, x_dim=x_dim, y_dim=y_dim, training=False)
    jax.block_until_ready((loss, KL, NLL, mse, y_mu, y_sig))

    assert y_mu.shape == (B, num_tgt, y_dim)
    assert y_sig.shape == (B, num_tgt, y_dim)
    assert jnp.all(y_sig > 0.1)
    assert jnp.all(jnp.isfinite(loss)) and jnp.all(jnp.isfinite(mse))
    print("KERNEL_OK")
</pallas_src>

<mosaic_0001>
module attributes {stable_mosaic.version = 11 : i64} {
  func.func @_np_fused_kernel(%arg0: i32, %arg1: memref<3x40xf32, #tpu.memory_space<vmem>>, %arg2: memref<40x4xf32, #tpu.memory_space<vmem>>, %arg3: memref<2x24xf32, #tpu.memory_space<vmem>>, %arg4: memref<2x24xf32, #tpu.memory_space<vmem>>, %arg5: memref<16x2xf32, #tpu.memory_space<vmem>>, %arg6: memref<32x3xf32, #tpu.memory_space<vmem>>, %arg7: memref<32x1xf32, #tpu.memory_space<vmem>>, %arg8: memref<32x32xf32, #tpu.memory_space<vmem>>, %arg9: memref<32x1xf32, #tpu.memory_space<vmem>>, %arg10: memref<32x32xf32, #tpu.memory_space<vmem>>, %arg11: memref<32x1xf32, #tpu.memory_space<vmem>>, %arg12: memref<32x2xf32, #tpu.memory_space<vmem>>, %arg13: memref<32x16xf32, #tpu.memory_space<vmem>>, %arg14: memref<32x1xf32, #tpu.memory_space<vmem>>, %arg15: memref<32x32xf32, #tpu.memory_space<vmem>>, %arg16: memref<32x1xf32, #tpu.memory_space<vmem>>, %arg17: memref<2x32xf32, #tpu.memory_space<vmem>>, %arg18: memref<2x1xf32, #tpu.memory_space<vmem>>, %arg19: memref<32x4xf32, #tpu.memory_space<vmem>>, %arg20: memref<2x24xf32, #tpu.memory_space<vmem>>) attributes {dimension_semantics = [#tpu.dimension_semantics<arbitrary>], iteration_bounds = array<i64: 1>, scalar_prefetch = 0 : i64, scratch_operands = 0 : i64, tpu.core_type = #tpu.core_type<tc>, window_params = [{pipeline_mode = #tpu.pipeline_mode<synchronous>, transform_indices = @transform_0, window_bounds = array<i64: 3, 40>}, {pipeline_mode = #tpu.pipeline_mode<synchronous>, transform_indices = @transform_1, window_bounds = array<i64: 40, 4>}, {pipeline_mode = #tpu.pipeline_mode<synchronous>, transform_indices = @transform_2, window_bounds = array<i64: 2, 24>}, {pipeline_mode = #tpu.pipeline_mode<synchronous>, transform_indices = @transform_3, window_bounds = array<i64: 2, 24>}, {pipeline_mode = #tpu.pipeline_mode<synchronous>, transform_indices = @transform_4, window_bounds = array<i64: 16, 2>}, {pipeline_mode = #tpu.pipeline_mode<synchronous>, transform_indices = @transform_5, window_bounds = array<i64: 32, 3>}, {pipeline_mode = #tpu.pipeline_mode<synchronous>, transform_indices = @transform_6, window_bounds = array<i64: 32, 1>}, {pipeline_mode = #tpu.pipeline_mode<synchronous>, transform_indices = @transform_7, window_bounds = array<i64: 32, 32>}, {pipeline_mode = #tpu.pipeline_mode<synchronous>, transform_indices = @transform_8, window_bounds = array<i64: 32, 1>}, {pipeline_mode = #tpu.pipeline_mode<synchronous>, transform_indices = @transform_9, window_bounds = array<i64: 32, 32>}, {pipeline_mode = #tpu.pipeline_mode<synchronous>, transform_indices = @transform_10, window_bounds = array<i64: 32, 1>}, {pipeline_mode = #tpu.pipeline_mode<synchronous>, transform_indices = @transform_11, window_bounds = array<i64: 32, 2>}, {pipeline_mode = #tpu.pipeline_mode<synchronous>, transform_indices = @transform_12, window_bounds = array<i64: 32, 16>}, {pipeline_mode = #tpu.pipeline_mode<synchronous>, transform_indices = @transform_13, window_bounds = array<i64: 32, 1>}, {pipeline_mode = #tpu.pipeline_mode<synchronous>, transform_indices = @transform_14, window_bounds = array<i64: 32, 32>}, {pipeline_mode = #tpu.pipeline_mode<synchronous>, transform_indices = @transform_15, window_bounds = array<i64: 32, 1>}, {pipeline_mode = #tpu.pipeline_mode<synchronous>, transform_indices = @transform_16, window_bounds = array<i64: 2, 32>}, {pipeline_mode = #tpu.pipeline_mode<synchronous>, transform_indices = @transform_17, window_bounds = array<i64: 2, 1>}, {pipeline_mode = #tpu.pipeline_mode<synchronous>, transform_indices = @transform_18, window_bounds = array<i64: 32, 4>}, {pipeline_mode = #tpu.pipeline_mode<synchronous>, transform_indices = @transform_19, window_bounds = array<i64: 2, 24>}]} {
    %c0 = arith.constant 0 : index
    %c0_0 = arith.constant 0 : index
    %0 = vector.load %arg6[%c0, %c0_0] : memref<32x3xf32, #tpu.memory_space<vmem>>, vector<32x3xf32>
    %c0_1 = arith.constant 0 : index
    %c0_2 = arith.constant 0 : index
    %1 = vector.load %arg1[%c0_1, %c0_2] : memref<3x40xf32, #tpu.memory_space<vmem>>, vector<3x40xf32>
    %cst = arith.constant dense<0.000000e+00> : vector<32x40xf32>
    %2 = tpu.matmul %0, %1, %cst {dimension_numbers = #tpu.dot_dimension_numbers<[1], [0], [0], [1], [0, 0, 1, 1], [], []>} : vector<32x3xf32>, vector<3x40xf32>, vector<32x40xf32> -> vector<32x40xf32>
    %c0_3 = arith.constant 0 : index
    %c0_4 = arith.constant 0 : index
    %3 = vector.load %arg7[%c0_3, %c0_4] : memref<32x1xf32, #tpu.memory_space<vmem>>, vector<32x1xf32>
    %4 = vector.broadcast %3 : vector<32x1xf32> to vector<32x40xf32>
    %5 = arith.addf %2, %4 : vector<32x40xf32>
    %cst_5 = arith.constant 0.000000e+00 : f32
    %6 = vector.broadcast %cst_5 : f32 to vector<32x40xf32>
    %7 = arith.maximumf %5, %6 : vector<32x40xf32>
    %c0_6 = arith.constant 0 : index
    %c0_7 = arith.constant 0 : index
    %8 = vector.load %arg8[%c0_6, %c0_7] : memref<32x32xf32, #tpu.memory_space<vmem>>, vector<32x32xf32>
    %cst_8 = arith.constant dense<0.000000e+00> : vector<32x40xf32>
    %9 = tpu.matmul %8, %7, %cst_8 {dimension_numbers = #tpu.dot_dimension_numbers<[1], [0], [0], [1], [0, 0, 1, 1], [], []>} : vector<32x32xf32>, vector<32x40xf32>, vector<32x40xf32> -> vector<32x40xf32>
    %c0_9 = arith.constant 0 : index
    %c0_10 = arith.constant 0 : index
    %10 = vector.load %arg9[%c0_9, %c0_10] : memref<32x1xf32, #tpu.memory_space<vmem>>, vector<32x1xf32>
    %11 = vector.broadcast %10 : vector<32x1xf32> to vector<32x40xf32>
    %12 = arith.addf %9, %11 : vector<32x40xf32>
    %cst_11 = arith.constant 0.000000e+00 : f32
    %13 = vector.broadcast %cst_11 : f32 to vector<32x40xf32>
    %14 = arith.maximumf %12, %13 : vector<32x40xf32>
    %c0_12 = arith.constant 0 : index
    %c0_13 = arith.constant 0 : index
    %15 = vector.load %arg2[%c0_12, %c0_13] : memref<40x4xf32, #tpu.memory_space<vmem>>, vector<40x4xf32>
    %cst_14 = arith.constant dense<0.000000e+00> : vector<32x4xf32>
    %16 = tpu.matmul %14, %15, %cst_14 {dimension_numbers = #tpu.dot_dimension_numbers<[1], [0], [0], [1], [0, 0, 1, 1], [], []>} : vector<32x40xf32>, vector<40x4xf32>, vector<32x4xf32> -> vector<32x4xf32>
    %c0_15 = arith.constant 0 : index
    %c0_16 = arith.constant 0 : index
    %17 = vector.load %arg10[%c0_15, %c0_16] : memref<32x32xf32, #tpu.memory_space<vmem>>, vector<32x32xf32>
    %cst_17 = arith.constant dense<0.000000e+00> : vector<32x4xf32>
    %18 = tpu.matmul %17, %16, %cst_17 {dimension_numbers = #tpu.dot_dimension_numbers<[1], [0], [0], [1], [0, 0, 1, 1], [], []>} : vector<32x32xf32>, vector<32x4xf32>, vector<32x4xf32> -> vector<32x4xf32>
    %c0_18 = arith.constant 0 : index
    %c0_19 = arith.constant 0 : index
    %19 = vector.load %arg11[%c0_18, %c0_19] : memref<32x1xf32, #tpu.memory_space<vmem>>, vector<32x1xf32>
    %20 = vector.broadcast %19 : vector<32x1xf32> to vector<32x4xf32>
    %21 = arith.addf %18, %20 : vector<32x4xf32>
    %22 = tpu.iota {dimensions = array<i32: 0>} : vector<32x4xi32>
    %c16_i32 = arith.constant 16 : i32
    %23 = vector.broadcast %c16_i32 : i32 to vector<32x4xi32>
    %24 = arith.cmpi slt, %22, %23 : vector<32x4xi32>
    %25 = arith.negf %21 : vector<32x4xf32>
    %26 = math.exp %25 : vector<32x4xf32>
    %cst_20 = arith.constant 1.000000e+00 : f32
    %27 = vector.broadcast %cst_20 : f32 to vector<32x4xf32>
    %28 = arith.addf %27, %26 : vector<32x4xf32>
    %29 = arith.divf %27, %28 : vector<32x4xf32>
    %cst_21 = arith.constant 0.899999976 : f32
    %30 = vector.broadcast %cst_21 : f32 to vector<32x4xf32>
    %31 = arith.mulf %30, %29 : vector<32x4xf32>
    %cst_22 = arith.constant 1.000000e-01 : f32
    %32 = vector.broadcast %cst_22 : f32 to vector<32x4xf32>
    %33 = arith.addf %32, %31 : vector<32x4xf32>
    %34 = arith.select %24, %21, %33 : vector<32x4xi1>, vector<32x4xf32>
    %c0_23 = arith.constant 0 : index
    %c0_24 = arith.constant 0 : index
    %35 = vector.load %arg19[%c0_23, %c0_24] : memref<32x4xf32, #tpu.memory_space<vmem>>, vector<32x4xf32>
    tpu.vector_store %arg19[%c0_23, %c0_24], %34 {strides = array<i32>} : memref<32x4xf32, #tpu.memory_space<vmem>>, vector<32x4xf32>,
    %36 = vector.extract_strided_slice %34 {offsets = [0, 0], sizes = [16, 2], strides = [1, 1]} : vector<32x4xf32> to vector<16x2xf32>
    %37 = vector.extract_strided_slice %34 {offsets = [16, 0], sizes = [16, 2], strides = [1, 1]} : vector<32x4xf32> to vector<16x2xf32>
    %c0_25 = arith.constant 0 : index
    %c0_26 = arith.constant 0 : index
    %38 = vector.load %arg5[%c0_25, %c0_26] : memref<16x2xf32, #tpu.memory_space<vmem>>, vector<16x2xf32>
    %39 = arith.mulf %37, %38 : vector<16x2xf32>
    %40 = arith.addf %36, %39 : vector<16x2xf32>
    %c0_27 = arith.constant 0 : index
    %c0_28 = arith.constant 0 : index
    %41 = vector.load %arg13[%c0_27, %c0_28] : memref<32x16xf32, #tpu.memory_space<vmem>>, vector<32x16xf32>
    %cst_29 = arith.constant dense<0.000000e+00> : vector<32x2xf32>
    %42 = tpu.matmul %41, %40, %cst_29 {dimension_numbers = #tpu.dot_dimension_numbers<[1], [0], [0], [1], [0, 0, 1, 1], [], []>} : vector<32x16xf32>, vector<16x2xf32>, vector<32x2xf32> -> vector<32x2xf32>
    %c0_30 = arith.constant 0 : index
    %c0_31 = arith.constant 0 : index
    %43 = vector.load %arg14[%c0_30, %c0_31] : memref<32x1xf32, #tpu.memory_space<vmem>>, vector<32x1xf32>
    %44 = vector.broadcast %43 : vector<32x1xf32> to vector<32x2xf32>
    %45 = arith.addf %42, %44 : vector<32x2xf32>
    %c0_32 = arith.constant 0 : index
    %c0_33 = arith.constant 0 : index
    %46 = vector.load %arg4[%c0_32, %c0_33] : memref<2x24xf32, #tpu.memory_space<vmem>>, vector<2x24xf32>
    %cst_34 = arith.constant dense<0.000000e+00> : vector<32x24xf32>
    %47 = tpu.matmul %45, %46, %cst_34 {dimension_numbers = #tpu.dot_dimension_numbers<[1], [0], [0], [1], [0, 0, 1, 1], [], []>} : vector<32x2xf32>, vector<2x24xf32>, vector<32x24xf32> -> vector<32x24xf32>
    %c0_35 = arith.constant 0 : index
    %c0_36 = arith.constant 0 : index
    %48 = vector.load %arg12[%c0_35, %c0_36] : memref<32x2xf32, #tpu.memory_space<vmem>>, vector<32x2xf32>
    %c0_37 = arith.constant 0 : index
    %c0_38 = arith.constant 0 : index
    %49 = vector.load %arg3[%c0_37, %c0_38] : memref<2x24xf32, #tpu.memory_space<vmem>>, vector<2x24xf32>
    %cst_39 = arith.constant dense<0.000000e+00> : vector<32x24xf32>
    %50 = tpu.matmul %48, %49, %cst_39 {dimension_numbers = #tpu.dot_dimension_numbers<[1], [0], [0], [1], [0, 0, 1, 1], [], []>} : vector<32x2xf32>, vector<2x24xf32>, vector<32x24xf32> -> vector<32x24xf32>
    %51 = arith.addf %50, %47 : vector<32x24xf32>
    %cst_40 = arith.constant 0.000000e+00 : f32
    %52 = vector.broadcast %cst_40 : f32 to vector<32x24xf32>
    %53 = arith.maximumf %51, %52 : vector<32x24xf32>
    %c0_41 = arith.constant 0 : index
    %c0_42 = arith.constant 0 : index
    %54 = vector.load %arg15[%c0_41, %c0_42] : memref<32x32xf32, #tpu.memory_space<vmem>>, vector<32x32xf32>
    %cst_43 = arith.constant dense<0.000000e+00> : vector<32x24xf32>
    %55 = tpu.matmul %54, %53, %cst_43 {dimension_numbers = #tpu.dot_dimension_numbers<[1], [0], [0], [1], [0, 0, 1, 1], [], []>} : vector<32x32xf32>, vector<32x24xf32>, vector<32x24xf32> -> vector<32x24xf32>
    %c0_44 = arith.constant 0 : index
    %c0_45 = arith.constant 0 : index
    %56 = vector.load %arg16[%c0_44, %c0_45] : memref<32x1xf32, #tpu.memory_space<vmem>>, vector<32x1xf32>
    %57 = vector.broadcast %56 : vector<32x1xf32> to vector<32x24xf32>
    %58 = arith.addf %55, %57 : vector<32x24xf32>
    %cst_46 = arith.constant 0.000000e+00 : f32
    %59 = vector.broadcast %cst_46 : f32 to vector<32x24xf32>
    %60 = arith.maximumf %58, %59 : vector<32x24xf32>
    %c0_47 = arith.constant 0 : index
    %c0_48 = arith.constant 0 : index
    %61 = vector.load %arg17[%c0_47, %c0_48] : memref<2x32xf32, #tpu.memory_space<vmem>>, vector<2x32xf32>
    %cst_49 = arith.constant dense<0.000000e+00> : vector<2x24xf32>
    %62 = tpu.matmul %61, %60, %cst_49 {dimension_numbers = #tpu.dot_dimension_numbers<[1], [0], [0], [1], [0, 0, 1, 1], [], []>} : vector<2x32xf32>, vector<32x24xf32>, vector<2x24xf32> -> vector<2x24xf32>
    %c0_50 = arith.constant 0 : index
    %c0_51 = arith.constant 0 : index
    %63 = vector.load %arg18[%c0_50, %c0_51] : memref<2x1xf32, #tpu.memory_space<vmem>>, vector<2x1xf32>
    %64 = vector.broadcast %63 : vector<2x1xf32> to vector<2x24xf32>
    %65 = arith.addf %62, %64 : vector<2x24xf32>
    %66 = tpu.iota {dimensions = array<i32: 0>} : vector<2x24xi32>
    %c1_i32 = arith.constant 1 : i32
    %67 = vector.broadcast %c1_i32 : i32 to vector<2x24xi32>
    %68 = arith.cmpi slt, %66, %67 : vector<2x24xi32>
    %cst_52 = arith.constant 0.000000e+00 : f32
    %69 = vector.broadcast %cst_52 : f32 to vector<2x24xf32>
    %70 = arith.maximumf %65, %69 : vector<2x24xf32>
    %71 = vector.broadcast %cst_52 : f32 to vector<2x24xf32>
    %72 = arith.subf %65, %71 : vector<2x24xf32>
    %73 = arith.cmpf one, %72, %72 : vector<2x24xf32>
    %74 = vector.broadcast %cst_52 : f32 to vector<2x24xf32>
    %75 = arith.addf %65, %74 : vector<2x24xf32>
    %76 = math.absf %72 : vector<2x24xf32>
    %cst_53 = arith.constant 0.000000e+00 : f32
    %77 = vector.broadcast %cst_53 : f32 to vector<2x24xf32>
    %78 = arith.subf %77, %76 : vector<2x24xf32>
    %79 = math.exp %78 : vector<2x24xf32>
    %80 = math.log1p %79 : vector<2x24xf32>
    %81 = arith.addf %70, %80 : vector<2x24xf32>
    %82 = arith.select %73, %75, %81 : vector<2x24xi1>, vector<2x24xf32>
    %cst_54 = arith.constant 0.899999976 : f32
    %83 = vector.broadcast %cst_54 : f32 to vector<2x24xf32>
    %84 = arith.mulf %83, %82 : vector<2x24xf32>
    %cst_55 = arith.constant 1.000000e-01 : f32
    %85 = vector.broadcast %cst_55 : f32 to vector<2x24xf32>
    %86 = arith.addf %85, %84 : vector<2x24xf32>
    %87 = arith.select %68, %65, %86 : vector<2x24xi1>, vector<2x24xf32>
    %c0_56 = arith.constant 0 : index
    %c0_57 = arith.constant 0 : index
    %88 = vector.load %arg20[%c0_56, %c0_57] : memref<2x24xf32, #tpu.memory_space<vmem>>, vector<2x24xf32>
    tpu.vector_store %arg20[%c0_56, %c0_57], %87 {strides = array<i32>} : memref<2x24xf32, #tpu.memory_space<vmem>>, vector<2x24xf32>,
    return
  }
  func.func @transform_0(%arg0: i32) -> (i32, i32) {
    %c0_i32 = arith.constant 0 : i32
    %c0_i32_0 = arith.constant 0 : i32
    %c0_i32_1 = arith.constant 0 : i32
    return %c0_i32, %c0_i32_0 : i32, i32
  }
  func.func @transform_1(%arg0: i32) -> (i32, i32) {
    %c0_i32 = arith.constant 0 : i32
    %c0_i32_0 = arith.constant 0 : i32
    %c0_i32_1 = arith.constant 0 : i32
    return %c0_i32, %c0_i32_0 : i32, i32
  }
  func.func @transform_2(%arg0: i32) -> (i32, i32) {
    %c0_i32 = arith.constant 0 : i32
    %c0_i32_0 = arith.constant 0 : i32
    %c0_i32_1 = arith.constant 0 : i32
    return %c0_i32, %c0_i32_0 : i32, i32
  }
  func.func @transform_3(%arg0: i32) -> (i32, i32) {
    %c0_i32 = arith.constant 0 : i32
    %c0_i32_0 = arith.constant 0 : i32
    %c0_i32_1 = arith.constant 0 : i32
    return %c0_i32, %c0_i32_0 : i32, i32
  }
  func.func @transform_4(%arg0: i32) -> (i32, i32) {
    %c0_i32 = arith.constant 0 : i32
    %c0_i32_0 = arith.constant 0 : i32
    %c0_i32_1 = arith.constant 0 : i32
    return %c0_i32, %c0_i32_0 : i32, i32
  }
  func.func @transform_5(%arg0: i32) -> (i32, i32) {
    %c0_i32 = arith.constant 0 : i32
    %c0_i32_0 = arith.constant 0 : i32
    %c0_i32_1 = arith.constant 0 : i32
    return %c0_i32, %c0_i32_0 : i32, i32
  }
  func.func @transform_6(%arg0: i32) -> (i32, i32) {
    %c0_i32 = arith.constant 0 : i32
    %c0_i32_0 = arith.constant 0 : i32
    %c0_i32_1 = arith.constant 0 : i32
    return %c0_i32, %c0_i32_0 : i32, i32
  }
  func.func @transform_7(%arg0: i32) -> (i32, i32) {
    %c0_i32 = arith.constant 0 : i32
    %c0_i32_0 = arith.constant 0 : i32
    %c0_i32_1 = arith.constant 0 : i32
    return %c0_i32, %c0_i32_0 : i32, i32
  }
  func.func @transform_8(%arg0: i32) -> (i32, i32) {
    %c0_i32 = arith.constant 0 : i32
    %c0_i32_0 = arith.constant 0 : i32
    %c0_i32_1 = arith.constant 0 : i32
    return %c0_i32, %c0_i32_0 : i32, i32
  }
  func.func @transform_9(%arg0: i32) -> (i32, i32) {
    %c0_i32 = arith.constant 0 : i32
    %c0_i32_0 = arith.constant 0 : i32
    %c0_i32_1 = arith.constant 0 : i32
    return %c0_i32, %c0_i32_0 : i32, i32
  }
  func.func @transform_10(%arg0: i32) -> (i32, i32) {
    %c0_i32 = arith.constant 0 : i32
    %c0_i32_0 = arith.constant 0 : i32
    %c0_i32_1 = arith.constant 0 : i32
    return %c0_i32, %c0_i32_0 : i32, i32
  }
  func.func @transform_11(%arg0: i32) -> (i32, i32) {
    %c0_i32 = arith.constant 0 : i32
    %c0_i32_0 = arith.constant 0 : i32
    %c0_i32_1 = arith.constant 0 : i32
    return %c0_i32, %c0_i32_0 : i32, i32
  }
  func.func @transform_12(%arg0: i32) -> (i32, i32) {
    %c0_i32 = arith.constant 0 : i32
    %c0_i32_0 = arith.constant 0 : i32
    %c0_i32_1 = arith.constant 0 : i32
    return %c0_i32, %c0_i32_0 : i32, i32
  }
  func.func @transform_13(%arg0: i32) -> (i32, i32) {
    %c0_i32 = arith.constant 0 : i32
    %c0_i32_0 = arith.constant 0 : i32
    %c0_i32_1 = arith.constant 0 : i32
    return %c0_i32, %c0_i32_0 : i32, i32
  }
  func.func @transform_14(%arg0: i32) -> (i32, i32) {
    %c0_i32 = arith.constant 0 : i32
    %c0_i32_0 = arith.constant 0 : i32
    %c0_i32_1 = arith.constant 0 : i32
    return %c0_i32, %c0_i32_0 : i32, i32
  }
  func.func @transform_15(%arg0: i32) -> (i32, i32) {
    %c0_i32 = arith.constant 0 : i32
    %c0_i32_0 = arith.constant 0 : i32
    %c0_i32_1 = arith.constant 0 : i32
    return %c0_i32, %c0_i32_0 : i32, i32
  }
  func.func @transform_16(%arg0: i32) -> (i32, i32) {
    %c0_i32 = arith.constant 0 : i32
    %c0_i32_0 = arith.constant 0 : i32
    %c0_i32_1 = arith.constant 0 : i32
    return %c0_i32, %c0_i32_0 : i32, i32
  }
  func.func @transform_17(%arg0: i32) -> (i32, i32) {
    %c0_i32 = arith.constant 0 : i32
    %c0_i32_0 = arith.constant 0 : i32
    %c0_i32_1 = arith.constant 0 : i32
    return %c0_i32, %c0_i32_0 : i32, i32
  }
  func.func @transform_18(%arg0: i32) -> (i32, i32) {
    %c0_i32 = arith.constant 0 : i32
    %c0_i32_0 = arith.constant 0 : i32
    %c0_i32_1 = arith.constant 0 : i32
    return %c0_i32, %c0_i32_0 : i32, i32
  }
  func.func @transform_19(%arg0: i32) -> (i32, i32) {
    %c0_i32 = arith.constant 0 : i32
    %c0_i32_0 = arith.constant 0 : i32
    %c0_i32_1 = arith.constant 0 : i32
    return %c0_i32, %c0_i32_0 : i32, i32
  }
}

</mosaic_0001>

<bundles_post_ra>
// kernel: eq.29
= control target key start
LH: loop header
LB: loop body
LE: loop exit
PB: predicated region body
PF: predicated region fallthrough
CT: control target
= control target key end

     0   :  { %vm8_vm0 = vcmask 97280   ;;  %vm14_vm1 = vcmask 195680   ;;  %s42_s0 = inlined_call_operand.vmem [shape: s32[2,12], index: 0, kind: input, shape index: {}]   ;;  %s43_s1 = inlined_call_operand.vmem [shape: s32[24], index: 1, kind: output, shape index: {}]  }
   0x1   :  { %v5_v0 = vld [vmem:[%s42_s0] sm:$0x3]  ;;  %s25_s0 = smov 12  }
   0x2   :  { %6 = vst [vmem:[#allocation1] sm:$0x3] %v5_v0 }
   0x9   :  { %v11_v1 = vld [vmem:[#allocation1 + $0x1] sm:$0x1]   ;;  %v7_v2 = vld [vmem:[#allocation1] sm:$0x1]  }
   0xa   :  { %12 = vrot.lane.b32.xlu0 %v11_v1, %s25_s0  ;;  %9 = vst.msk [vmem:[#allocation0] sm:$0x1] %vm8_vm0, %v7_v2  }
  0x7c   :  { %v13_v3 = vpop.permute.xlu0 %12  }
  0x7d   :  { %15 = vst.msk [vmem:[#allocation0] sm:$0x1] %vm14_vm1, %v13_v3  }
  0x84   :  { %v20_v4 = vld [vmem:[#allocation0] sm:$0x1] }
  0x85   :  { %23 = vst [vmem:[%s43_s1] sm:$0x1] %v20_v4 }

// kernel: eq.22
= control target key start
LH: loop header
LB: loop body
LE: loop exit
PB: predicated region body
PF: predicated region fallthrough
CT: control target
= control target key end

     0   :  { %vm8_vm0 = vcmask 64512   ;;  %vm14_vm1 = vcmask 130112   ;;  %s42_s0 = inlined_call_operand.vmem [shape: s32[2,8], index: 0, kind: input, shape index: {}]   ;;  %s43_s1 = inlined_call_operand.vmem [shape: s32[16], index: 1, kind: output, shape index: {}]  }
   0x1   :  { %v5_v0 = vld [vmem:[%s42_s0] sm:$0x3]  ;;  %s25_s0 = smov 8  }
   0x2   :  { %6 = vst [vmem:[#allocation1] sm:$0x3] %v5_v0 }
   0x9   :  { %v11_v1 = vld [vmem:[#allocation1 + $0x1] sm:$0x1]   ;;  %v7_v2 = vld [vmem:[#allocation1] sm:$0x1]  }
   0xa   :  { %12 = vrot.lane.b32.xlu0 %v11_v1, %s25_s0  ;;  %9 = vst.msk [vmem:[#allocation0] sm:$0x1] %vm8_vm0, %v7_v2  }
  0x7c   :  { %v13_v3 = vpop.permute.xlu0 %12  }
  0x7d   :  { %15 = vst.msk [vmem:[#allocation0] sm:$0x1] %vm14_vm1, %v13_v3  }
  0x84   :  { %v20_v4 = vld [vmem:[#allocation0] sm:$0x1] }
  0x85   :  { %23 = vst [vmem:[%s43_s1] sm:$0x1] %v20_v4 }

// kernel: np_forward.1
= control target key start
LH: loop header
LB: loop body
LE: loop exit
PB: predicated region body
PF: predicated region fallthrough
CT: control target
= control target key end

     0   :  { %vm103_vm0 = vcmask 1042432   ;;  %vm90_vm1 = vcmask 23552   ;;  %v1408_v3 = vmov 0   ;;  %vm224_vm2 = vcmask 261120   ;;  %s1727_s0 = inlined_call_operand.vmem [shape: f32[3,40], index: 0, kind: input, shape index: {}]   ;;  %s1728_s5 = inlined_call_operand.vmem [shape: f32[32,3], index: 5, kind: input, shape index: {}]   ;;  %s1729_s6 = inlined_call_operand.vmem [shape: f32[32,1], index: 6, kind: input, shape index: {}]   ;;  %s1730_s8 = inlined_call_operand.vmem [shape: f32[32,1], index: 8, kind: input, shape index: {}]   ;;  %s1731_s10 = inlined_call_operand.vmem [shape: f32[32,1], index: 10, kind: input, shape index: {}]   ;;  %s1732_s13 = inlined_call_operand.vmem [shape: f32[32,1], index: 13, kind: input, shape index: {}]   ;;  %s1733_s15 = inlined_call_operand.vmem [shape: f32[32,1], index: 15, kind: input, shape index: {}]   ;;  %s1734_s17 = inlined_call_operand.vmem [shape: f32[2,1], index: 17, kind: input, shape index: {}]   ;;  %s1735_s7 = inlined_call_operand.vmem [shape: f32[32,32], index: 7, kind: input, shape index: {}]   ;;  %s1736_s1 = inlined_call_operand.vmem [shape: f32[40,4], index: 1, kind: input, shape index: {}]   ;;  %s1737_s9 = inlined_call_operand.vmem [shape: f32[32,32], index: 9, kind: input, shape index: {}]   ;;  %s1738_s12 = inlined_call_operand.vmem [shape: f32[32,16], index: 12, kind: input, shape index: {}]   ;;  %s1739_s18 = inlined_call_operand.vmem [shape: f32[32,4], index: 18, kind: output, shape index: {0}]   ;;  %s1740_s4 = inlined_call_operand.vmem [shape: f32[16,2], index: 4, kind: input, shape index: {}]   ;;  %s1741_s2 = inlined_call_operand.vmem [shape: f32[2,24], index: 2, kind: input, shape index: {}]   ;;  %s1742_s11 = inlined_call_operand.vmem [shape: f32[32,2], index: 11, kind: input, shape index: {}]   ;;  %s1743_s3 = inlined_call_operand.vmem [shape: f32[2,24], index: 3, kind: input, shape index: {}]   ;;  %s1744_s14 = inlined_call_operand.vmem [shape: f32[32,32], index: 14, kind: input, shape index: {}]   ;;  %s1745_s16 = inlined_call_operand.vmem [shape: f32[2,32], index: 16, kind: input, shape index: {}]   ;;  %s1746_s19 = inlined_call_operand.vmem [shape: f32[2,24], index: 19, kind: output, shape index: {1}]  }
   0x1   :  { %1750 = sst [smem:[#allocation2_spill]] %s1727_s0  ;;  %1394 = vset.pattern.permute.xlu0 %v1408_v3  ;;  %1395 = vset.pattern.permute.xlu1 %v1408_v3  ;;  %v436_v14 = vld [vmem:[%s1731_s10 + $0x18] sm:$0xff]  ;;  %v435_v15 = vld [vmem:[%s1731_s10 + $0x10] sm:$0xff]  ;;  %v434_v16 = vld [vmem:[%s1731_s10 + $0x8] sm:$0xff]  ;;  %vm331_vm3 = vcmask 326656   ;;  %vm638_vm4 = vcmask 130048  }
   0x2   :  { %1751 = sst [smem:[#allocation3_spill]] %s1728_s5  ;;  %v433_v17 = vld [vmem:[%s1731_s10] sm:$0xff]  ;;  %v615_v19 = vld [vmem:[%s1732_s13 + $0x8] sm:$0xff]  ;;  %v616_v20 = vld [vmem:[%s1732_s13 + $0x10] sm:$0xff]  ;;  %vm599_vm5 = vcmask 31744   ;;  %vm750_vm6 = vcmask 1041408  }
   0x3   :  { %1752 = sst [smem:[#allocation4_spill]] %s1729_s6  ;;  %v614_v18 = vld [vmem:[%s1732_s13] sm:$0xff]  ;;  %v617_v21 = vld [vmem:[%s1732_s13 + $0x18] sm:$0xff]  ;;  %v954_v23 = vld [vmem:[%s1733_s15 + $0x10] sm:$0xff]  ;;  %vm737_vm7 = vcmask 15360   ;;  %vm1410_vm8 = vmmov 0  }
   0x4   :  { %1753 = sst [smem:[#allocation5_spill]] %s1730_s8  ;;  %v955_v22 = vld [vmem:[%s1733_s15 + $0x18] sm:$0xff]  ;;  %v953_v24 = vld [vmem:[%s1733_s15 + $0x8] sm:$0xff]  ;;  %v952_v25 = vld [vmem:[%s1733_s15] sm:$0xff]  ;;  %vm1179_vm12 = vcmask 189440  }
   0x5   :  { %s1754_s20 = sld [smem:[#allocation2_spill]]  ;;  %v1078_v26 = vld [vmem:[%s1734_s17] sm:$0x3]  ;;  %v197_v45 = vld [vmem:[%s1735_s7 + $0x8] sm:$0xff]  ;;  %v198_v46 = vld [vmem:[%s1735_s7 + $0x10] sm:$0xff] }
   0x6   :  { %s1755_s22 = sld [smem:[#allocation3_spill]]  ;;  %v196_v27 = vld [vmem:[%s1735_s7] sm:$0xff]  ;;  %v199_v47 = vld [vmem:[%s1735_s7 + $0x18] sm:$0xff]  ;;  %v328_v49 = vld [vmem:[%s1736_s1 + $0x10] sm:$0xff] }
   0x7   :  { %s1756_s27 = sld [smem:[#allocation4_spill]]  ;;  %1304 = vmatprep.mubr.msk.f32.mxu1 %vm224_vm2, %v196_v27  ;;  %v330_v28 = vld [vmem:[%s1736_s1 + $0x20] sm:$0xff]  ;;  %v329_v48 = vld [vmem:[%s1736_s1 + $0x18] sm:$0xff]  ;;  %v327_v50 = vld [vmem:[%s1736_s1 + $0x8] sm:$0xff] }
   0x8   :  { %s1757_s25 = sld [smem:[#allocation5_spill]]  ;;  %v326_v51 = vld [vmem:[%s1736_s1] sm:$0xff] }
   0xb   :  { %v65_v0 = vld [vmem:[%s1754_s20] sm:$0x7] }
   0xc   :  { %v61_v1 = vld [vmem:[%s1755_s22] sm:$0xff]  ;;  %v62_v2 = vld [vmem:[%s1755_s22 + $0x8] sm:$0xff]  ;;  %1288 = vmatprep.subr.msk.mxu0 %vm103_vm0, %v65_v0  ;;  %v63_v4 = vld [vmem:[%s1755_s22 + $0x10] sm:$0xff] }
   0xd   :  { %1290 = vmatprep.mubr.msk.f32.mxu0 %vm90_vm1, %v61_v1  ;;  %v69_v5 = vld [vmem:[%s1756_s27 + $0x18] sm:$0xff]  ;;  %1289 = vmatpush3.msk.msra.mxu0 %vm103_vm0, %v65_v0  ;;  %v67_v6 = vld [vmem:[%s1756_s27 + $0x8] sm:$0xff]  ;;  %v68_v7 = vld [vmem:[%s1756_s27 + $0x10] sm:$0xff] }
   0xe   :  { %87 = vperm.xlu0 %1394, %v69_v5   ;;  %1291 = vmatmul.mubr.msk.f32.vlgmr.msra.gmra.mxu0 %vm90_vm1, %v62_v2  ;;  %v64_v8 = vld [vmem:[%s1755_s22 + $0x18] sm:$0xff]  ;;  %v66_v9 = vld [vmem:[%s1756_s27] sm:$0xff]  ;;  %v201_v11 = vld [vmem:[%s1757_s25 + $0x8] sm:$0xff] }
   0xf   :  { %77 = vperm.xlu1 %1395, %v67_v6   ;;  %1293 = vmatprep.mubr.msk.f32.mxu0 %vm90_vm1, %v63_v4  ;;  %v200_v10 = vld [vmem:[%s1757_s25] sm:$0xff]  ;;  %v202_v12 = vld [vmem:[%s1757_s25 + $0x10] sm:$0xff]  ;;  %v203_v13 = vld [vmem:[%s1757_s25 + $0x18] sm:$0xff] }
  0x10   :  { %1310 = vmatprep.subr.mxu0 %v330_v28  ;;  %v429_v4 = vld [vmem:[%s1737_s9] sm:$0xff] }
  0x11   :  { %1311 = vmatpush3.msra.mxu0 %v330_v28 }
  0x12   :  { %82 = vperm.xlu0 %1394, %v68_v7   ;;  %1294 = vmatmul.mubr.msk.f32.gmra.mxu0 %vm90_vm1, %v64_v8 }
  0x13   :  { %72 = vperm.xlu1 %1395, %v66_v9   ;;  %1312 = vmatprep.subr.mxu0 %v329_v48  ;;  %v430_v9 = vld [vmem:[%s1737_s9 + $0x8] sm:$0xff] }
  0x14   :  { %1313 = vmatpush3.msra.mxu0 %v329_v48  ;;  %v736_v48 = vld [vmem:[%s1743_s3] sm:$0x3] }
  0x15   :  { %1314 = vmatprep.subr.mxu0 %v328_v49 }
  0x16   :  { %206 = vperm.xlu0 %1394, %v200_v10   ;;  %1315 = vmatpush3.msra.mxu0 %v328_v49  ;;  %v431_v10 = vld [vmem:[%s1737_s9 + $0x10] sm:$0xff]  ;;  %v840_v49 = vld [vmem:[%s1742_s11 + $0x8] sm:$0xff] }
  0x17   :  { %211 = vperm.xlu1 %1395, %v201_v11   ;;  %1316 = vmatprep.subr.mxu0 %v327_v50  ;;  %v432_v11 = vld [vmem:[%s1737_s9 + $0x18] sm:$0xff] }
  0x18   :  { %1317 = vmatpush3.msra.mxu0 %v327_v50  ;;  %v841_v50 = vld [vmem:[%s1742_s11 + $0x10] sm:$0xff] }
  0x19   :  { %1318 = vmatprep.subr.mxu0 %v326_v51 }
  0x1a   :  { %216 = vperm.xlu0 %1394, %v202_v12   ;;  %1319 = vmatpush3.msra.mxu0 %v326_v51  ;;  %v610_v12 = vld [vmem:[%s1738_s12] sm:$0xff]  ;;  %v842_v51 = vld [vmem:[%s1742_s11 + $0x18] sm:$0xff] }
  0x1b   :  { %221 = vperm.xlu1 %1395, %v203_v13  }
  0x1e   :  { %454 = vperm.xlu0 %1394, %v436_v14  }
  0x1f   :  { %449 = vperm.xlu1 %1395, %v435_v15  }
  0x22   :  { %444 = vperm.xlu0 %1394, %v434_v16  }
  0x23   :  { %439 = vperm.xlu1 %1395, %v433_v17  }
  0x26   :  { %620 = vperm.xlu0 %1394, %v614_v18  }
  0x27   :  { %625 = vperm.xlu1 %1395, %v615_v19  }
  0x2a   :  { %630 = vperm.xlu0 %1394, %v616_v20  }
  0x2b   :  { %635 = vperm.xlu1 %1395, %v617_v21  }
  0x2e   :  { %973 = vperm.xlu0 %1394, %v955_v22  }
  0x2f   :  { %968 = vperm.xlu1 %1395, %v954_v23  }
  0x32   :  { %963 = vperm.xlu0 %1394, %v953_v24  }
  0x33   :  { %958 = vperm.xlu1 %1395, %v952_v25  }
  0x36   :  { %1081 = vperm.xlu0 %1394, %v1078_v26  }
  0x89   :  { %v88_v29 = vpop.permute.xlu0 %87 }
  0x8a   :  { %v78_v31 = vpop.permute.xlu1 %77 }
  0x8d   :  { %v83_v35 = vpop.permute.xlu0 %82 }
  0x8e   :  { %v73_v40 = vpop.permute.xlu1 %72 }
  0x91   :  { %v207_v53 = vpop.permute.xlu0 %206 }
  0x92   :  { %v212_v52 = vpop.permute.xlu1 %211 }
  0x95   :  { %v217_v61 = vpop.permute.xlu0 %216 }
  0x96   :  { %v222_v59 = vpop.permute.xlu1 %221 }
  0x99   :  { %v455_v13 = vpop.permute.xlu0 %454 }
  0x9a   :  { %v450_v14 = vpop.permute.xlu1 %449 }
  0x9d   :  { %v445_v15 = vpop.permute.xlu0 %444 }
  0x9e   :  { %v440_v18 = vpop.permute.xlu1 %439 }
  0xce   :  { %v1292_v30 = vpop.f32.mrf.mxu0 }
  0xcf   :  { %v179_v37 = vadd.f32 %v1292_v30, %v78_v31 }
  0xd0   :  { %v173_v32 = vpop.f32.mrf.mxu0 }
  0xd1   :  { %v174_v41 = vadd.f32 %v173_v32, %v73_v40  ;;  %v193_v43 = vmax.f32 %v179_v37, 0.0  ;;  %v604_v37 = vld [vmem:[%s1740_s4] sm:$0xff] }
  0xd2   :  { %v1295_v33 = vpop.f32.mrf.mxu0 }
  0xd3   :  { %v189_v34 = vadd.f32 %v1295_v33, %v88_v29  ;;  %v192_v44 = vmax.f32 %v174_v41, 0.0 }
  0xd4   :  { %v183_v36 = vpop.f32.mrf.mxu0 }
  0xd5   :  { %v195_v38 = vmax.f32 %v189_v34, 0.0  ;;  %v184_v39 = vadd.f32 %v183_v36, %v83_v35  ;;  %v605_v34 = vld [vmem:[%s1740_s4 + $0x8] sm:$0xff] }
  0xd7   :  { %v194_v42 = vmax.f32 %v184_v39, 0.0  ;;  %1296 = vmatprep.subr.mxu1 %v195_v38 }
  0xd8   :  { %1297 = vmatpush3.msra.mxu1 %v195_v38 }
  0xd9   :  { %1298 = vmatprep.subr.mxu1 %v194_v42 }
  0xda   :  { %1299 = vmatpush3.msra.mxu1 %v194_v42 }
  0xdb   :  { %1300 = vmatprep.subr.mxu1 %v193_v43 }
  0xdc   :  { %1301 = vmatpush3.msra.mxu1 %v193_v43  ;;  %v611_v43 = vld [vmem:[%s1738_s12 + $0x8] sm:$0xff] }
  0xdd   :  { %1302 = vmatprep.subr.mxu1 %v192_v44 }
  0xde   :  { %1303 = vmatpush3.msra.mxu1 %v192_v44  ;;  %v612_v44 = vld [vmem:[%s1738_s12 + $0x10] sm:$0xff] }
  0xdf   :  { %1305 = vmatmul.mubr.msk.f32.vlgmr.msra.gmra.mxu1 %vm224_vm2, %v197_v45  ;;  %v613_v45 = vld [vmem:[%s1738_s12 + $0x18] sm:$0xff] }
  0xe0   :  { %1307 = vmatprep.mubr.msk.f32.mxu1 %vm224_vm2, %v198_v46  ;;  %v843_v46 = vld [vmem:[%s1741_s2] sm:$0x3] }
  0xe3   :  { %1308 = vmatmul.mubr.msk.f32.gmra.mxu1 %vm224_vm2, %v199_v47  ;;  %v839_v47 = vld [vmem:[%s1742_s11] sm:$0xff] }
  0xe4   :  { %1334 = vmatprep.mubr.msk.f32.mxu1 %vm224_vm2, %v429_v4 }
 0x19f   :  { %v1306_v54 = vpop.f32.mrf.mxu1 }
 0x1a0   :  { %v309_v55 = vadd.f32 %v1306_v54, %v212_v52  ;;  %v621_v52 = vpop.permute.xlu0 %620  ;;  %v626_v54 = vpop.permute.xlu1 %625 }
 0x1a1   :  { %v303_v56 = vpop.f32.mrf.mxu1 }
 0x1a2   :  { %v304_v57 = vadd.f32 %v303_v56, %v207_v53  ;;  %v323_v62 = vmax.f32 %v309_v55, 0.0 }
 0x1a3   :  { %v1309_v58 = vpop.f32.mrf.mxu1 }
 0x1a4   :  { %v322_v60 = vmax.f32 %v304_v57, 0.0  ;;  %v319_v63 = vadd.f32 %v1309_v58, %v222_v59  ;;  %v631_v59 = vpop.permute.xlu0 %630 }
 0x1a5   :  { %v313_v0 = vpop.f32.mrf.mxu1 }
 0x1a6   :  { %v314_v1 = vadd.f32 %v313_v0, %v217_v61  ;;  %1320 = vmatprep.mubr.msk.f32.mxu0 %vm331_vm3, %v322_v60  ;;  %v325_v3 = vmax.f32 %v319_v63, 0.0  ;;  %v636_v61 = vpop.permute.xlu1 %635  ;;  %v948_v0 = vld [vmem:[%s1744_s14] sm:$0xff] }
 0x1a7   :  { %1321 = vmatmul.mubr.msk.f32.vlgmr.msra.gmra.mxu0 %vm331_vm3, %v323_v62 }
 0x1a8   :  { %v324_v2 = vmax.f32 %v314_v1, 0.0 }
 0x1aa   :  { %1323 = vmatprep.mubr.msk.f32.mxu0 %vm331_vm3, %v324_v2 }
 0x1ab   :  { %1324 = vmatmul.mubr.msk.f32.gmra.mxu0 %vm331_vm3, %v325_v3 }
 0x1ac   :  { %1344 = vmatprep.mubr.msk.f32.mxu0 %vm638_vm4, %v610_v12 }
 0x267   :  { %v1322_v5 = vpop.f32.mrf.mxu0 }
 0x269   :  { %v410_v6 = vpop.f32.mrf.mxu0 }
 0x26b   :  { %v1325_v7 = vpop.f32.mrf.mxu0 }
 0x26c   :  { %1326 = vmatprep.subr.mxu1 %v1325_v7 }
 0x26d   :  { %v420_v8 = vpop.f32.mrf.mxu0  ;;  %1327 = vmatpush3.msra.mxu1 %v1325_v7 }
 0x26e   :  { %1328 = vmatprep.subr.mxu1 %v420_v8 }
 0x26f   :  { %1329 = vmatpush3.msra.mxu1 %v420_v8 }
 0x270   :  { %1330 = vmatprep.subr.mxu1 %v1322_v5 }
 0x271   :  { %1331 = vmatpush3.msra.mxu1 %v1322_v5 }
 0x272   :  { %1332 = vmatprep.subr.mxu1 %v410_v6 }
 0x273   :  { %1333 = vmatpush3.msra.mxu1 %v410_v6 }
 0x274   :  { %1335 = vmatmul.mubr.msk.f32.vlgmr.msra.gmra.mxu1 %vm224_vm2, %v430_v9  ;;  %1350 = vmatprep.subr.msk.mxu1 %vm750_vm6, %v736_v48 }
 0x275   :  { %1337 = vmatprep.mubr.msk.f32.mxu1 %vm224_vm2, %v431_v10  ;;  %1351 = vmatpush3.msk.msra.mxu1 %vm750_vm6, %v736_v48 }
 0x278   :  { %1338 = vmatmul.mubr.msk.f32.gmra.mxu1 %vm224_vm2, %v432_v11 }
 0x334   :  { %v1336_v16 = vpop.f32.mrf.mxu1 }
 0x335   :  { %v541_v17 = vadd.f32 %v1336_v16, %v445_v15 }
 0x336   :  { %v535_v19 = vpop.f32.mrf.mxu1 }
 0x337   :  { %601 = vst.msk [vmem:[%s1739_s18 + $0x8] sm:$0xff] %vm599_vm5, %v541_v17  ;;  %v536_v20 = vadd.f32 %v535_v19, %v440_v18  ;;  %v950_v18 = vld [vmem:[%s1744_s14 + $0x10] sm:$0xff]  ;;  %v951_v19 = vld [vmem:[%s1744_s14 + $0x18] sm:$0xff] }
 0x338   :  { %v1339_v21 = vpop.f32.mrf.mxu1 }
 0x339   :  { %600 = vst.msk [vmem:[%s1739_s18] sm:$0xff] %vm599_vm5, %v536_v20  ;;  %v551_v22 = vadd.f32 %v1339_v21, %v455_v13  ;;  %v974_v21 = vpop.permute.xlu0 %973 }
 0x33a   :  { %v545_v23 = vpop.f32.mrf.mxu1 }
 0x33b   :  { %v1209_v24 = vmul.f32 -1.442695, %v551_v22  ;;  %v546_v25 = vadd.f32 %v545_v23, %v450_v14  ;;  %v969_v23 = vpop.permute.xlu1 %968 }
 0x33d   :  { %1396 = vpow2.f32 %v1209_v24  ;;  %v1208_v26 = vmul.f32 -1.442695, %v546_v25 }
 0x33f   :  { %1398 = vpow2.f32 %v1208_v26 }
 0x34a   :  { %v1397_v27 = vpop.eup %1396 }
 0x34b   :  { %v578_v28 = vadd.f32 1.0, %v1397_v27  ;;  %v964_v27 = vpop.permute.xlu0 %963 }
 0x34c   :  { %v1399_v29 = vpop.eup %1398 }
 0x34d   :  { %1400 = vrcp.f32 %v578_v28  ;;  %v577_v30 = vadd.f32 1.0, %v1399_v29 }
 0x34f   :  { %1402 = vrcp.f32 %v577_v30 }
 0x35a   :  { %v1401_v31 = vpop.eup %1400 }
 0x35b   :  { %v590_v32 = vmul.f32 0.9, %v1401_v31 }
 0x35c   :  { %v1403_v33 = vpop.eup %1402 }
 0x35d   :  { %v594_v35 = vadd.f32 0.1, %v590_v32  ;;  %v589_v36 = vmul.f32 0.9, %v1403_v33  ;;  %v959_v32 = vpop.permute.xlu1 %958 }
 0x35f   :  { %603 = vst.msk [vmem:[%s1739_s18 + $0x18] sm:$0xff] %vm599_vm5, %v594_v35  ;;  %v607_v38 = vmul.f32 %v605_v34, %v594_v35  ;;  %v593_v39 = vadd.f32 0.1, %v589_v36 }
 0x361   :  { %v609_v40 = vadd.f32 %v607_v38, %v541_v17  ;;  %602 = vst.msk [vmem:[%s1739_s18 + $0x10] sm:$0xff] %vm599_vm5, %v593_v39  ;;  %v606_v41 = vmul.f32 %v604_v37, %v593_v39  ;;  %v949_v17 = vld [vmem:[%s1744_s14 + $0x8] sm:$0xff]  ;;  %v1077_v37 = vld [vmem:[%s1745_s16] sm:$0x3]  ;;  %v1082_v38 = vpop.permute.xlu0 %1081 }
 0x363   :  { %1340 = vmatprep.subr.mxu0 %v609_v40  ;;  %v608_v42 = vadd.f32 %v606_v41, %v536_v20  ;;  %v1409_v20 = vmov 0.0  }
 0x364   :  { %1341 = vmatpush3.msra.mxu0 %v609_v40 }
 0x365   :  { %1342 = vmatprep.subr.mxu0 %v608_v42 }
 0x366   :  { %1343 = vmatpush3.msra.mxu0 %v608_v42 }
 0x367   :  { %1345 = vmatmul.mubr.msk.f32.vlgmr.msra.gmra.mxu0 %vm638_vm4, %v611_v43  ;;  %1358 = vmatprep.subr.msk.mxu0 %vm750_vm6, %v843_v46 }
 0x368   :  { %1347 = vmatprep.mubr.msk.f32.mxu0 %vm638_vm4, %v612_v44  ;;  %1359 = vmatpush3.msk.msra.mxu0 %vm750_vm6, %v843_v46 }
 0x369   :  { %1380 = vmatprep.subr.mxu0 %v1409_v20 }
 0x36b   :  { %1348 = vmatmul.mubr.msk.f32.gmra.mxu0 %vm638_vm4, %v613_v45 }
 0x36c   :  { %1360 = vmatprep.mubr.msk.f32.mxu0 %vm737_vm7, %v839_v47 }
 0x36f   :  { %1361 = vmatmul.mubr.msk.f32.vlgmr.msra.gmra.mxu0 %vm737_vm7, %v840_v49 }
 0x370   :  { %1363 = vmatprep.mubr.msk.f32.mxu0 %vm737_vm7, %v841_v50 }
 0x373   :  { %1364 = vmatmul.mubr.msk.f32.gmra.mxu0 %vm737_vm7, %v842_v51  ;;  %v554_v51 = vlaneseq }
 0x374   :  { %1388 = vmatprep.mubr.msk.f32.mxu0 %vm1410_vm8, %v1409_v20 }
 0x427   :  { %v1346_v53 = vpop.f32.mrf.mxu0 }
 0x428   :  { %v723_v57 = vadd.f32 %v1346_v53, %v626_v54 }
 0x429   :  { %v717_v55 = vpop.f32.mrf.mxu0 }
 0x42a   :  { %v718_v56 = vadd.f32 %v717_v55, %v621_v52 }
 0x42b   :  { %v1349_v58 = vpop.f32.mrf.mxu0 }
 0x42c   :  { %1352 = vmatprep.mubr.msk.f32.mxu1 %vm737_vm7, %v718_v56  ;;  %v733_v63 = vadd.f32 %v1349_v58, %v636_v61  ;;  %v555_v56 = vshrl.u32 %v554_v51, 7 }
 0x42d   :  { %v727_v60 = vpop.f32.mrf.mxu0  ;;  %1353 = vmatmul.mubr.msk.f32.vlgmr.msra.gmra.mxu1 %vm737_vm7, %v723_v57 }
 0x42e   :  { %v728_v62 = vadd.f32 %v727_v60, %v631_v59  ;;  %vm1157_vm11 = vcmp.lt.s32.totalorder %v555_v56, 1 }
 0x42f   :  { %v1362_v1 = vpop.f32.mrf.mxu0 }
 0x430   :  { %1355 = vmatprep.mubr.msk.f32.mxu1 %vm737_vm7, %v728_v62 }
 0x431   :  { %1356 = vmatmul.mubr.msk.f32.gmra.mxu1 %vm737_vm7, %v733_v63  ;;  %v925_v2 = vpop.f32.mrf.mxu0 }
 0x432   :  { %1374 = vmatprep.mubr.msk.f32.mxu1 %vm224_vm2, %v948_v0 }
 0x433   :  { %v1365_v5 = vpop.f32.mrf.mxu0 }
 0x435   :  { %v935_v9 = vpop.f32.mrf.mxu0 }
 0x4ed   :  { %v1354_v3 = vpop.f32.mrf.mxu1 }
 0x4ee   :  { %v931_v10 = vadd.f32 %v1362_v1, %v1354_v3 }
 0x4ef   :  { %v820_v4 = vpop.f32.mrf.mxu1 }
 0x4f0   :  { %v926_v13 = vadd.f32 %v925_v2, %v820_v4  ;;  %v945_v15 = vmax.f32 %v931_v10, 0.0 }
 0x4f1   :  { %v1357_v6 = vpop.f32.mrf.mxu1 }
 0x4f2   :  { %v941_v7 = vadd.f32 %v1365_v5, %v1357_v6  ;;  %v944_v16 = vmax.f32 %v926_v13, 0.0 }
 0x4f3   :  { %v830_v8 = vpop.f32.mrf.mxu1 }
 0x4f4   :  { %v947_v11 = vmax.f32 %v941_v7, 0.0  ;;  %v936_v12 = vadd.f32 %v935_v9, %v830_v8 }
 0x4f6   :  { %v946_v14 = vmax.f32 %v936_v12, 0.0  ;;  %1366 = vmatprep.subr.mxu1 %v947_v11 }
 0x4f7   :  { %1367 = vmatpush3.msra.mxu1 %v947_v11 }
 0x4f8   :  { %1368 = vmatprep.subr.mxu1 %v946_v14 }
 0x4f9   :  { %1369 = vmatpush3.msra.mxu1 %v946_v14 }
 0x4fa   :  { %1370 = vmatprep.subr.mxu1 %v945_v15 }
 0x4fb   :  { %1371 = vmatpush3.msra.mxu1 %v945_v15 }
 0x4fc   :  { %1372 = vmatprep.subr.mxu1 %v944_v16 }
 0x4fd   :  { %1373 = vmatpush3.msra.mxu1 %v944_v16 }
 0x4fe   :  { %1375 = vmatmul.mubr.msk.f32.vlgmr.msra.gmra.mxu1 %vm224_vm2, %v949_v17 }
 0x4ff   :  { %1377 = vmatprep.mubr.msk.f32.mxu1 %vm224_vm2, %v950_v18 }
 0x502   :  { %1378 = vmatmul.mubr.msk.f32.gmra.mxu1 %vm224_vm2, %v951_v19 }
 0x5be   :  { %v1376_v22 = vpop.f32.mrf.mxu1 }
 0x5bf   :  { %v1060_v29 = vadd.f32 %v1376_v22, %v964_v27 }
 0x5c0   :  { %v1054_v24 = vpop.f32.mrf.mxu1 }
 0x5c1   :  { %v1055_v33 = vadd.f32 %v1054_v24, %v959_v32  ;;  %v1074_v35 = vmax.f32 %v1060_v29, 0.0 }
 0x5c2   :  { %v1379_v25 = vpop.f32.mrf.mxu1 }
 0x5c3   :  { %v1070_v26 = vadd.f32 %v1379_v25, %v974_v21  ;;  %v1073_v36 = vmax.f32 %v1055_v33, 0.0 }
 0x5c4   :  { %v1064_v28 = vpop.f32.mrf.mxu1 }
 0x5c5   :  { %v1076_v30 = vmax.f32 %v1070_v26, 0.0  ;;  %v1065_v31 = vadd.f32 %v1064_v28, %v969_v23 }
 0x5c7   :  { %v1075_v34 = vmax.f32 %v1065_v31, 0.0  ;;  %1381 = vmatpush3.msra.mxu0 %v1076_v30 }
 0x5c8   :  { %1382 = vmatprep.subr.mxu0 %v1409_v20 }
 0x5c9   :  { %1383 = vmatpush3.msra.mxu0 %v1075_v34 }
 0x5ca   :  { %1384 = vmatprep.subr.mxu0 %v1409_v20 }
 0x5cb   :  { %1385 = vmatpush3.msra.mxu0 %v1074_v35 }
 0x5cc   :  { %1386 = vmatprep.subr.mxu0 %v1409_v20 }
 0x5cd   :  { %1387 = vmatpush3.msra.mxu0 %v1073_v36 }
 0x5ce   :  { %1389 = vmatmul.mubr.msk.f32.vlgmr.msra.gmra.mxu0 %vm224_vm2, %v1077_v37 }
 0x68e   :  { %v1153_v39 = vpop.f32.mrf.mxu0 }
 0x68f   :  { %v1154_v40 = vadd.f32 %v1153_v39, %v1082_v38 }
 0x690   :  { %v1390_v41 = vpop.f32.mrf.mxu0 }
 0x691   :  { %v1161_v42 = vand.u32 2147483647, %v1154_v40  ;;  %v1158_v54 = vmax.f32 %v1154_v40, 0.0  ;;  %vm1159_vm10 = vcmp.ne.f32.partialorder %v1154_v40, %v1154_v40 }
 0x693   :  { %v1162_v43 = vsub.f32 0.0, %v1161_v42 }
 0x695   :  { %v1163_v44 = vmul.f32 1.442695, %v1162_v43 }
 0x697   :  { %1404 = vpow2.f32 %v1163_v44 }
 0x6a4   :  { %v1405_v45 = vpop.eup %1404 }
 0x6a5   :  { %v1165_v46 = vadd.f32 1.0, %v1405_v45  ;;  %v1168_v47 = vmul.f32 -0.5, %v1405_v45  ;;  %v1171_v49 = vand.u32 2147483647, %v1405_v45 }
 0x6a7   :  { %1406 = vlog2.f32 %v1165_v46  ;;  %v1169_v48 = vadd.f32 1.0, %v1168_v47  ;;  %vm1172_vm9 = vcmp.lt.f32.partialorder %v1171_v49, 0.0004427343 }
 0x6a9   :  { %v1170_v53 = vmul.f32 %v1405_v45, %v1169_v48 }
 0x6b4   :  { %v1407_v50 = vpop.eup %1406 }
 0x6b5   :  { %v1167_v52 = vmul.f32 0.6931472, %v1407_v50 }
 0x6b7   :  { %v1173_v55 = vsel %vm1172_vm9, %v1170_v53, %v1167_v52 }
 0x6b8   :  { %v1174_v57 = vadd.f32 %v1173_v55, %v1158_v54 }
 0x6ba   :  { %v1175_v58 = vsel %vm1159_vm10, %v1154_v40, %v1174_v57 }
 0x6bb   :  { %v1176_v59 = vmul.f32 0.9, %v1175_v58 }
 0x6bd   :  { %v1177_v60 = vadd.f32 0.1, %v1176_v59 }
 0x6bf   :  { %v1178_v61 = vsel %vm1157_vm11, %v1154_v40, %v1177_v60 }
 0x6c0   :  { %1180 = vst.msk [vmem:[%s1746_s19] sm:$0x3] %vm1179_vm12, %v1178_v61 }

</bundles_post_ra>
